<compile_context>
chip_gen: v6e
topology: v6e:2x2x1
jax: 0.10.0
libtpu: 0.0.40
codegen_flags: <defaults>
</compile_context>

<pallas_src>
import jax
import jax.numpy as jnp
from jax.experimental import pallas as pl
from jax.experimental.pallas import tpu as pltpu

N_CH = 8   # conv output channels
KSZ = 3    # conv kernel size

_X_BLOCK_BUDGET = 4 * 1024 * 1024   # bytes per x tile (Pallas double-buffers it -> 8 MiB)
_MXU_MAX_D = 512                    # route the row-reduce through the MXU when D <= this


def _round_up(a, m):
    return (a + m - 1) // m * m


def _round_down(a, m):
    return a // m * m


def _make_kernel(use_mxu):
    def cnn_kernel(x_ref, w_ref, b_ref, o_ref):
        # x_ref: (TB, D)                 native dtype (f32/bf16) VMEM batch tile
        # w_ref: (D, 1) mxu / (1, D) vpu f32 VMEM folded weight (grid-resident)
        # b_ref: (1, 1)                  f32 SMEM folded scalar bias
        # o_ref: (1, 1, TB)              f32 VMEM lane-dense output (batch on lanes)
        x = x_ref[...].astype(jnp.float32)              # in-register upcast (bf16 ok)
        if use_mxu:
            # MXU matvec: no (TB, D) elementwise temp; reduction runs on the
            # otherwise-idle MXU instead of saturating XLU slots (v7x).
            s2 = jnp.dot(x, w_ref[...], preferred_element_type=jnp.float32)   # (TB, 1)
            s = jnp.sum(s2, axis=1)                                           # (TB,)
        else:
            # Large D: VPU multiply + one cross-lane reduce per row.
            s = jnp.sum(x * w_ref[...], axis=1)                               # (TB,)
        y = jax.nn.sigmoid(s + b_ref[0, 0])
        o_ref[...] = y.reshape(1, 1, -1)                # lane-dense store
    return cnn_kernel


def _choose_tile(B, D, itemsize):
    """Batch-tile rows: byte-budgeted, lane/sublane friendly, megacore friendly."""
    tb = _round_down(_X_BLOCK_BUDGET // (itemsize * D), 128)
    if tb == 0:
        # Extremely large D: shrink rows (floor 8) rather than blow the budget.
        # TODO(synk): for D ~> 1e5 add a D ("arbitrary") grid axis + f32 accumulator
        # scratch instead of relying on a single (8, D) block fitting VMEM.
        tb = max(8, _round_down(_X_BLOCK_BUDGET // (itemsize * D), 8))
    if B >= 256:
        # at least 2 grid steps so the "parallel" axis shards across both v7x TCs
        tb = min(tb, _round_up(-(-B // 2), 128))
    if B <= 8:
        tb = B                       # block == full batch dim (allowed by Mosaic)
    else:
        tb = min(tb, _round_up(B, 8))
    return tb


def cnn_forward(x, conv_w, conv_b, fc_w, fc_b):
    """x: (B, D) f32/bf16; conv_w: (8,1,3); conv_b: (8,); fc_w: (1, 8*(D-2)); fc_b: (1,)."""
    B, D = x.shape
    L = D - KSZ + 1

    # --- fold conv + fc (both affine) into one weight vector / scalar bias -----
    cw2 = conv_w[:, 0, :].astype(jnp.float32)           # (8, 3)  single in-channel
    fw2 = fc_w.reshape(N_CH, L).astype(jnp.float32)     # (8, L)  channel-major flatten
    w_eff = jnp.zeros((D,), jnp.float32)
    for k in range(KSZ):
        w_eff = w_eff.at[k:k + L].add(cw2[:, k] @ fw2)  # (L,)
    b_eff = fc_b[0].astype(jnp.float32) + jnp.sum(
        conv_b.astype(jnp.float32) * jnp.sum(fw2, axis=1))

    # --- tiling (no wrapper-side pad/astype of x: zero extra HBM passes) -------
    itemsize = jnp.dtype(x.dtype).itemsize
    tb = _choose_tile(B, D, itemsize)
    g = -(-B // tb)                  # partial last block handled by Pallas, sliced below

    use_mxu = D <= _MXU_MAX_D
    w_arg = w_eff.reshape(D, 1) if use_mxu else w_eff.reshape(1, D)
    w_spec = (pl.BlockSpec((D, 1), lambda i: (0, 0)) if use_mxu
              else pl.BlockSpec((1, D), lambda i: (0, 0)))

    out = pl.pallas_call(
        _make_kernel(use_mxu),
        out_shape=jax.ShapeDtypeStruct((g, 1, tb), jnp.float32),
        grid=(g,),
        in_specs=[
            pl.BlockSpec((tb, D), lambda i: (i, 0)),            # x batch tile (native dtype)
            w_spec,                                             # folded weight (resident)
            pl.BlockSpec(memory_space=pltpu.MemorySpace.SMEM),  # scalar bias
        ],
        out_specs=pl.BlockSpec((1, 1, tb), lambda i: (i, 0, 0)),
        compiler_params=pltpu.CompilerParams(
            dimension_semantics=("parallel",),
            vmem_limit_bytes=32 * 1024 * 1024,
        ),
    )(x, w_arg, jnp.reshape(b_eff, (1, 1)))

    # rows >= B of the lane-dense output are padding from the partial last block
    return out.reshape(-1)[:B].reshape(B, 1)


def cnn_ref(x, conv_w, conv_b, fc_w, fc_b):
    """Pure-JAX reference mirroring the PyTorch forward (un-folded)."""
    B, D = x.shape
    L = D - KSZ + 1
    w = conv_w[:, 0, :]                                             # (8, 3)
    patches = jnp.stack([x[:, k:k + L] for k in range(KSZ)], -1)    # (B, L, 3)
    conv = jnp.einsum("blk,ck->bcl", patches.astype(jnp.float32),
                      w.astype(jnp.float32)) + conv_b[None, :, None]
    flat = conv.reshape(B, -1)                                      # (B, 8*L)
    y = flat @ fc_w.T + fc_b[None, :]
    return jax.nn.sigmoid(y)


if __name__ == "__main__":
    key = jax.random.PRNGKey(0)

    # Case 1: module-sized shapes (B=2, input_dim=16)  -> MXU matvec path.
    # Case 2: larger D, ragged batch (B=37, D=640)     -> VPU path + partial block.
    for (B, input_dim) in [(2, 16), (37, 640)]:
        L = input_dim - 2
        key, kx, kcw, kcb, kfw, kfb = jax.random.split(key, 6)

        x = jax.random.normal(kx, (B, input_dim), dtype=jnp.float32)
        conv_w = 0.1 * jax.random.normal(kcw, (N_CH, 1, KSZ), dtype=jnp.float32)
        conv_b = 0.1 * jax.random.normal(kcb, (N_CH,), dtype=jnp.float32)
        fc_w = 0.1 * jax.random.normal(kfw, (1, N_CH * L), dtype=jnp.float32)
        fc_b = 0.1 * jax.random.normal(kfb, (1,), dtype=jnp.float32)

        out = jax.block_until_ready(cnn_forward(x, conv_w, conv_b, fc_w, fc_b))
        ref = cnn_ref(x, conv_w, conv_b, fc_w, fc_b)
        assert out.shape == (B, 1), out.shape
        assert jnp.allclose(out, ref, atol=1e-5, rtol=1e-5), (B, input_dim, out, ref)

    print("KERNEL_OK")
</pallas_src>

<mosaic_0001>
module attributes {stable_mosaic.version = 11 : i64} {
  func.func @cnn_kernel(%arg0: i32, %arg1: memref<2x16xf32, #tpu.memory_space<vmem>>, %arg2: memref<16x1xf32, #tpu.memory_space<vmem>>, %arg3: memref<1x1xf32, #tpu.memory_space<smem>>, %arg4: memref<1x1x2xf32, #tpu.memory_space<vmem>>) attributes {dimension_semantics = [#tpu.dimension_semantics<parallel>], iteration_bounds = array<i64: 1>, scalar_prefetch = 0 : i64, scratch_operands = 0 : i64, tpu.core_type = #tpu.core_type<tc>, window_params = [{transform_indices = @transform_0, window_bounds = array<i64: 2, 16>}, {pipeline_mode = #tpu.pipeline_mode<synchronous>, transform_indices = @transform_1, window_bounds = array<i64: 16, 1>}, {transform_indices = @transform_2, window_bounds = array<i64: 1, 1>}, {transform_indices = @transform_3, window_bounds = array<i64: 1, 1, 2>}]} {
    %c0 = arith.constant 0 : index
    %c0_0 = arith.constant 0 : index
    %0 = vector.load %arg1[%c0, %c0_0] : memref<2x16xf32, #tpu.memory_space<vmem>>, vector<2x16xf32>
    %c0_1 = arith.constant 0 : index
    %c0_2 = arith.constant 0 : index
    %1 = vector.load %arg2[%c0_1, %c0_2] : memref<16x1xf32, #tpu.memory_space<vmem>>, vector<16x1xf32>
    %cst = arith.constant dense<0.000000e+00> : vector<2x1xf32>
    %2 = tpu.matmul %0, %1, %cst {dimension_numbers = #tpu.dot_dimension_numbers<[1], [0], [0], [1], [0, 0, 1, 1], [], []>} : vector<2x16xf32>, vector<16x1xf32>, vector<2x1xf32> -> vector<2x1xf32>
    %cst_3 = arith.constant dense<0.000000e+00> : vector<2xf32>
    %3 = vector.multi_reduction <add>, %2, %cst_3 [1] : vector<2x1xf32> to vector<2xf32>
    %c0_4 = arith.constant 0 : index
    %c0_5 = arith.constant 0 : index
    %4 = memref.load %arg3[%c0_4, %c0_5] : memref<1x1xf32, #tpu.memory_space<smem>>
    %5 = vector.broadcast %4 : f32 to vector<2xf32>
    %6 = arith.addf %3, %5 : vector<2xf32>
    %7 = arith.negf %6 : vector<2xf32>
    %8 = math.exp %7 : vector<2xf32>
    %cst_6 = arith.constant 1.000000e+00 : f32
    %9 = vector.broadcast %cst_6 : f32 to vector<2xf32>
    %10 = arith.addf %9, %8 : vector<2xf32>
    %11 = arith.divf %9, %10 : vector<2xf32>
    %12 = vector.shape_cast %11 : vector<2xf32> to vector<1x1x2xf32>
    %c0_7 = arith.constant 0 : index
    %c0_8 = arith.constant 0 : index
    %c0_9 = arith.constant 0 : index
    %13 = vector.load %arg4[%c0_7, %c0_8, %c0_9] : memref<1x1x2xf32, #tpu.memory_space<vmem>>, vector<1x1x2xf32>
    tpu.vector_store %arg4[%c0_7, %c0_8, %c0_9], %12 {strides = array<i32>} : memref<1x1x2xf32, #tpu.memory_space<vmem>>, vector<1x1x2xf32>,
    return
  }
  func.func @transform_0(%arg0: i32) -> (i32, i32) {
    %c0_i32 = arith.constant 0 : i32
    %c0_i32_0 = arith.constant 0 : i32
    return %arg0, %c0_i32 : i32, i32
  }
  func.func @transform_1(%arg0: i32) -> (i32, i32) {
    %c0_i32 = arith.constant 0 : i32
    %c0_i32_0 = arith.constant 0 : i32
    %c0_i32_1 = arith.constant 0 : i32
    return %c0_i32, %c0_i32_0 : i32, i32
  }
  func.func @transform_2(%arg0: i32) -> (i32, i32) {
    %c0_i32 = arith.constant 0 : i32
    %c0_i32_0 = arith.constant 0 : i32
    %c0_i32_1 = arith.constant 0 : i32
    return %c0_i32, %c0_i32_0 : i32, i32
  }
  func.func @transform_3(%arg0: i32) -> (i32, i32, i32) {
    %c0_i32 = arith.constant 0 : i32
    %c0_i32_0 = arith.constant 0 : i32
    %c0_i32_1 = arith.constant 0 : i32
    return %arg0, %c0_i32, %c0_i32_0 : i32, i32, i32
  }
}

</mosaic_0001>

<bundles_post_ra>
// kernel: tpu_custom_call.1
= control target key start
LH: loop header
LB: loop body
LE: loop exit
PB: predicated region body
PF: predicated region fallthrough
CT: control target
= control target key end

     0   :  { %v173_v1 = vmov 0.0   ;;  %vm174_vm0 = vmmov 0   ;;  %s212_s0 = inlined_call_operand.vmem [shape: f32[2,16], index: 0, kind: input, shape index: {}]   ;;  %s213_s1 = inlined_call_operand.vmem [shape: f32[16,1], index: 1, kind: input, shape index: {}]   ;;  %s214_s2 = inlined_call_operand.<no memory space> [shape: f32[1,1], index: 2, kind: input, shape index: {}]   ;;  %s215_s3 = inlined_call_operand.hbm [shape: f32[1,1,2], index: 3, kind: output, shape index: {}]  }
   0x1   :  { %v18_v0 = vld [vmem:[%s213_s1 + $0x8] sm:$0xff]  ;;  %135 = vmatprep.subr.mxu0 %v173_v1  ;;  %v17_v2 = vld [vmem:[%s213_s1] sm:$0xff]  ;;  %139 = vmatprep.mubr.msk.f32.mxu0 %vm174_vm0, %v173_v1 }
   0x2   :  { %9 = vsyncpa [#allocation4], 0  ;;  %136 = vmatpush3.msra.mxu0 %v18_v0  ;;  %v16_v3 = vld [vmem:[%s212_s0] sm:$0x3]  ;;  %vm19_vm1 = vcmask 130048   ;;  %v175_v4 = vmov 0   ;;  %v95_v5 = vstv %s214_s2  ;;  %v107_v13 = vlaneseq }
   0x3   :  { %137 = vmatprep.subr.mxu0 %v173_v1  ;;  %146 = vset.pattern.permute.xlu0 %v175_v4  ;;  %s176_s0 = smov [#allocation3]   ;;  %vm114_vm2 = vcmask 8192  }
   0x4   :  { %138 = vmatpush3.msra.mxu0 %v17_v2  ;;  %v108_v14 = vand.u32 127, %v107_v13  ;;  %v110_v15 = vshrl.u32 %v107_v13, 7  ;;  %s122_s1 = sshll.u32 %s176_s0, 4  ;;  %s123_s1 = int_to_ptr.vmem [resolvable:$true] %s122_s1 }
   0x5   :  { %140 = vmatmul.mubr.msk.f32.vlgmr.msra.gmra.mxu0 %vm19_vm1, %v16_v3  ;;  %s151_s2 = scalar_lea.vmem %s123_s1, 16  ;;  %s155_s20 = scalar_lea.vmem %s123_s1, 32 }
   0x6   :  { %v111_v16 = vsub.s32 %v108_v14, %v110_v15  ;;  %p152_p0 = scmp.ne.s32.totalorder %s123_s1, %s151_s2  ;;  %p156_p1 = scmp.lt.s32.totalorder %s123_s1, %s123_s1 }
   0x7   :  { %p157_p2 = scmp.lt.s32.totalorder %s155_s20, %s151_s2 }
   0x9   :  { %p158_p3 = por %p157_p2, %p156_p1 }
   0xb   :  { %p159_p4 = pnand %p158_p3, %p152_p0 }
  0xc5   :  { %v89_v6 = vpop.f32.mrf.mxu0 }
  0xc6   :  { %v96_v7 = vadd.f32 %v95_v5, %v89_v6 }
  0xc7   :  { %v141_v8 = vpop.f32.mrf.mxu0 }
  0xc8   :  { %v131_v9 = vmul.f32 -1.442695, %v96_v7 }
  0xca   :  { %147 = vpow2.f32 %v131_v9 }
  0xd7   :  { %v148_v10 = vpop.eup %147 }
  0xd8   :  { %v100_v11 = vadd.f32 1.0, %v148_v10 }
  0xda   :  { %149 = vrcp.f32 %v100_v11 }
  0xe7   :  { %v150_v12 = vpop.eup %149 }
  0xe8   :  { %105 = vperm.xlu0 %146, %v150_v12  }
 0x163   :  { %v106_v17 = vpop.permute.xlu0 %105 }
 0x164   :  { %v112_v18 = vrot.slane %v106_v17, %v111_v16 }
 0x166   :  { %115 = vst.msk [vmem:[#allocation3] sm:$0x1] %vm114_vm2, %v112_v18 }
 0x167   :  { %162 = shalt.err (!%p159_p4)
}
 0x168   :  { %125 = dma.vmem_to_hbm [thread:$0]  %s123_s1, 16, %s215_s3, [#allocation4]  }
 0x169   :  { %171 = dma.done.wait [#allocation4], 16  }
 0x16a   :  { %172 = vsyncadd [#allocation4], 4294967280 }
 0x16b   :  { %129 = vsyncpa [#allocation4], 1 }

</bundles_post_ra>
